<compile_context>
chip_gen: v5e
topology: v5e:2x2
jax: 0.10.0
libtpu: 0.0.40
codegen_flags: <defaults>
</compile_context>

<pallas_src>
import functools

import jax
import jax.numpy as jnp
from jax.experimental import pallas as pl
from jax.experimental.pallas import tpu as pltpu

_NEG_INF = -1e30
_LANE = 128


def _round_up(x, m):
    return ((x + m - 1) // m) * m


def _pick_group(bh, lq, lp, d_k, d_v, target_m=512, vmem_budget=8 << 20):
    """Largest divisor G of bh such that double-buffered per-step blocks fit a
    modest VMEM budget and the effective matmul M = G*lq does not needlessly
    exceed target_m once the 128 MXU rows are already filled."""
    best = 1
    for g in range(1, bh + 1):
        if bh % g:
            continue
        m = g * lq
        # double-buffered: q (bf16), v (bf16), out (f32), attn (f32)
        step_bytes = 2 * (m * d_k * 2 + g * lp * d_v * 2 + m * d_v * 4 + m * lp * 4)
        if step_bytes > vmem_budget:
            break
        if m > target_m and best * lq >= 128:
            break
        best = g
    return best


def _dense_attention_kernel(q_ref, w1_ref, b1_ref, w2_ref, b2_ref, v_ref,
                            out_ref, attn_ref):
    # q_ref:    (G*Lq, d_k)   bf16
    # w1_ref:   (d_k, Hp)     bf16     b1_ref: (1, Hp)  f32
    # w2_ref:   (Hp, Lp)      bf16     b2_ref: (1, Lp)  f32 (-1e30 on pad cols)
    # v_ref:    (G, Lp, d_v)  bf16     (zero rows beyond len_q)
    # out_ref:  (G, Lq, d_v)  f32
    # attn_ref: (G*Lq, Lp)    f32
    g, lq, _ = out_ref.shape
    lp = w2_ref.shape[1]

    # Head-independent projections as one large-M matmul (M = G*Lq).
    h = jnp.dot(q_ref[...], w1_ref[...], preferred_element_type=jnp.float32)
    h = jnp.maximum(h + b1_ref[...], 0.0)                       # (G*Lq, Hp) f32

    scores = jnp.dot(h.astype(jnp.bfloat16), w2_ref[...],
                     preferred_element_type=jnp.float32)
    scores = scores + b2_ref[...]                               # (G*Lq, Lp) f32

    # Numerically stable softmax; padded columns carry -1e30 -> exp == 0.
    m = jnp.max(scores, axis=-1, keepdims=True)
    e = jnp.exp(scores - m)
    s = jnp.sum(e, axis=-1, keepdims=True)
    r = pl.reciprocal(s, approx=True)       # EUP slot
    r = r * (2.0 - s * r)                   # one Newton step -> near-exact 1/s
    attn = e * r                            # (G*Lq, Lp) f32

    attn_ref[...] = attn.astype(attn_ref.dtype)

    # Only the final matmul is head-dependent: batched over G on the MXU.
    attn_b = attn.astype(jnp.bfloat16).reshape(g, lq, lp)
    out = jnp.einsum("gqk,gkd->gqd", attn_b, v_ref[...],
                     preferred_element_type=jnp.float32)
    out_ref[...] = out.astype(out_ref.dtype)


def dense_attention(q, v, len_q, params):
    """q: [B, H, Lq, d_k], v: [B, H, len_q, d_v]. Returns (output, dense_attn)."""
    w1, b1, w2, b2 = params          # w1: (d_k, d_hid), w2: (d_hid, max_seq_len)
    B, H, Lq, d_k = q.shape
    Bv, Hv, Lv, d_v = v.shape
    assert (B, H) == (Bv, Hv) and Lv == len_q
    assert Lq % 8 == 0, "Lq must be a multiple of 8 (sublane tiling)"
    d_hid = w1.shape[1]

    Hp = _round_up(d_hid, _LANE)     # lane-dense hidden dim
    Lp = _round_up(len_q, _LANE)     # lane-dense key/attn dim

    # Pad parameters once in the wrapper (static shapes):
    #   * extra hidden units: zero weights + zero bias -> relu(0) = 0, and the
    #     corresponding zero rows of W2 contribute nothing.
    #   * extra key columns: zero W2 columns + -1e30 bias -> softmax weight 0.
    w1_p = jnp.pad(w1, ((0, 0), (0, Hp - d_hid))).astype(jnp.bfloat16)
    b1_p = jnp.pad(b1, (0, Hp - d_hid)).reshape(1, Hp).astype(jnp.float32)
    w2_p = jnp.pad(w2[:, :len_q],
                   ((0, Hp - d_hid), (0, Lp - len_q))).astype(jnp.bfloat16)
    b2_p = jnp.pad(b2[:len_q], (0, Lp - len_q),
                   constant_values=_NEG_INF).reshape(1, Lp).astype(jnp.float32)

    BH = B * H
    G = _pick_group(BH, Lq, Lp, d_k, d_v)
    grid = BH // G

    # bf16 activations in HBM halve the per-step DMA bytes.
    q_f = q.reshape(BH * Lq, d_k).astype(jnp.bfloat16)
    v_f = jnp.pad(v.reshape(BH, len_q, d_v),
                  ((0, 0), (0, Lp - len_q), (0, 0))).astype(jnp.bfloat16)

    out_f, attn_f = pl.pallas_call(
        _dense_attention_kernel,
        out_shape=(
            jax.ShapeDtypeStruct((BH, Lq, d_v), q.dtype),
            jax.ShapeDtypeStruct((BH * Lq, Lp), q.dtype),
        ),
        grid_spec=pltpu.PrefetchScalarGridSpec(
            num_scalar_prefetch=0,
            grid=(grid,),
            in_specs=[
                pl.BlockSpec((G * Lq, d_k), lambda i: (i, 0)),
                pl.BlockSpec((d_k, Hp), lambda i: (0, 0)),      # constant index:
                pl.BlockSpec((1, Hp), lambda i: (0, 0)),        #   weights are
                pl.BlockSpec((Hp, Lp), lambda i: (0, 0)),       #   fetched once
                pl.BlockSpec((1, Lp), lambda i: (0, 0)),
                pl.BlockSpec((G, Lp, d_v), lambda i: (i, 0, 0)),
            ],
            out_specs=[
                pl.BlockSpec((G, Lq, d_v), lambda i: (i, 0, 0)),
                pl.BlockSpec((G * Lq, Lp), lambda i: (i, 0)),   # lane-dense attn
            ],
        ),
        compiler_params=pltpu.CompilerParams(
            dimension_semantics=("parallel",)),
    )(q_f, w1_p, b1_p, w2_p, b2_p, v_f)

    out = out_f.reshape(B, H, Lq, d_v)
    attn = attn_f.reshape(B, H, Lq, Lp)[..., :len_q]
    return out, attn


def init_params(key, d_k, d_hid, max_seq_len):
    """Deterministic params mimicking nn.Linear default init (uniform +-1/sqrt(fan_in))."""
    k1, k2, k3, k4 = jax.random.split(key, 4)
    bnd1 = 1.0 / (d_k ** 0.5)
    bnd2 = 1.0 / (d_hid ** 0.5)
    # Stored already transposed relative to PyTorch (in_features, out_features).
    w1 = jax.random.uniform(k1, (d_k, d_hid), jnp.float32, -bnd1, bnd1)
    b1 = jax.random.uniform(k2, (d_hid,), jnp.float32, -bnd1, bnd1)
    w2 = jax.random.uniform(k3, (d_hid, max_seq_len), jnp.float32, -bnd2, bnd2)
    b2 = jax.random.uniform(k4, (max_seq_len,), jnp.float32, -bnd2, bnd2)
    return w1, b1, w2, b2


def _reference(q, v, len_q, params):
    """Pure-JAX reference with the same bf16-operand / f32-accumulate precision."""
    w1, b1, w2, b2 = params
    bf = jnp.bfloat16
    h = jnp.einsum("bhqd,de->bhqe", q.astype(bf), w1.astype(bf),
                   preferred_element_type=jnp.float32) + b1
    h = jax.nn.relu(h)
    scores = jnp.einsum("bhqe,es->bhqs", h.astype(bf), w2.astype(bf)[:, :len_q],
                        preferred_element_type=jnp.float32) + b2[:len_q]
    attn = jax.nn.softmax(scores, axis=-1)
    out = jnp.einsum("bhqk,bhkd->bhqd", attn.astype(bf), v.astype(bf),
                     preferred_element_type=jnp.float32)
    return out, attn


if __name__ == "__main__":
    # Small synthetic shapes consistent with the module.
    B, H = 2, 2
    max_seq_len = 32
    d_k = 32
    d_hid = 64
    Lq = 16          # query length
    len_q = 8        # key/value length (slice of max_seq_len)
    d_v = 32

    key = jax.random.PRNGKey(0)
    kq, kv, kp = jax.random.split(key, 3)
    q = jax.random.normal(kq, (B, H, Lq, d_k), jnp.float32)
    v = jax.random.normal(kv, (B, H, len_q, d_v), jnp.float32)
    params = init_params(kp, d_k, d_hid, max_seq_len)

    fn = jax.jit(functools.partial(dense_attention, len_q=len_q, params=params))
    out, attn = fn(q, v)
    jax.block_until_ready((out, attn))

    out_ref, attn_ref = _reference(q, v, len_q, params)
    assert out.shape == (B, H, Lq, d_v) and attn.shape == (B, H, Lq, len_q)
    assert jnp.allclose(attn, attn_ref, atol=1e-3, rtol=1e-3), \
        float(jnp.max(jnp.abs(attn - attn_ref)))
    assert jnp.allclose(out, out_ref, atol=5e-3, rtol=5e-3), \
        float(jnp.max(jnp.abs(out - out_ref)))
    print("KERNEL_OK")
</pallas_src>

<mosaic_0001>
module attributes {stable_mosaic.version = 11 : i64} {
  func.func @_dense_attention_kernel(%arg0: i32, %arg1: memref<64x32xbf16, #tpu.memory_space<vmem>>, %arg2: memref<32x128xbf16, #tpu.memory_space<vmem>>, %arg3: memref<1x128xf32, #tpu.memory_space<vmem>>, %arg4: memref<128x128xbf16, #tpu.memory_space<vmem>>, %arg5: memref<1x128xf32, #tpu.memory_space<vmem>>, %arg6: memref<4x128x32xbf16, #tpu.memory_space<vmem>>, %arg7: memref<4x16x32xf32, #tpu.memory_space<vmem>>, %arg8: memref<64x128xf32, #tpu.memory_space<vmem>>) attributes {dimension_semantics = [#tpu.dimension_semantics<parallel>], iteration_bounds = array<i64: 1>, scalar_prefetch = 0 : i64, scratch_operands = 0 : i64, tpu.core_type = #tpu.core_type<tc>, window_params = [{transform_indices = @transform_0, window_bounds = array<i64: 64, 32>}, {pipeline_mode = #tpu.pipeline_mode<synchronous>, transform_indices = @transform_1, window_bounds = array<i64: 32, 128>}, {pipeline_mode = #tpu.pipeline_mode<synchronous>, transform_indices = @transform_2, window_bounds = array<i64: 1, 128>}, {pipeline_mode = #tpu.pipeline_mode<synchronous>, transform_indices = @transform_3, window_bounds = array<i64: 128, 128>}, {pipeline_mode = #tpu.pipeline_mode<synchronous>, transform_indices = @transform_4, window_bounds = array<i64: 1, 128>}, {transform_indices = @transform_5, window_bounds = array<i64: 4, 128, 32>}, {transform_indices = @transform_6, window_bounds = array<i64: 4, 16, 32>}, {transform_indices = @transform_7, window_bounds = array<i64: 64, 128>}]} {
    %c0 = arith.constant 0 : index
    %c0_0 = arith.constant 0 : index
    %0 = vector.load %arg1[%c0, %c0_0] : memref<64x32xbf16, #tpu.memory_space<vmem>>, vector<64x32xbf16>
    %c0_1 = arith.constant 0 : index
    %c0_2 = arith.constant 0 : index
    %1 = vector.load %arg2[%c0_1, %c0_2] : memref<32x128xbf16, #tpu.memory_space<vmem>>, vector<32x128xbf16>
    %cst = arith.constant dense<0.000000e+00> : vector<64x128xf32>
    %2 = tpu.matmul %0, %1, %cst {dimension_numbers = #tpu.dot_dimension_numbers<[1], [0], [0], [1], [0, 0, 1, 1], [], []>} : vector<64x32xbf16>, vector<32x128xbf16>, vector<64x128xf32> -> vector<64x128xf32>
    %c0_3 = arith.constant 0 : index
    %c0_4 = arith.constant 0 : index
    %3 = vector.load %arg3[%c0_3, %c0_4] : memref<1x128xf32, #tpu.memory_space<vmem>>, vector<1x128xf32>
    %4 = vector.broadcast %3 : vector<1x128xf32> to vector<64x128xf32>
    %5 = arith.addf %2, %4 : vector<64x128xf32>
    %cst_5 = arith.constant 0.000000e+00 : f32
    %6 = vector.broadcast %cst_5 : f32 to vector<64x128xf32>
    %7 = arith.maximumf %5, %6 : vector<64x128xf32>
    %8 = arith.truncf %7 : vector<64x128xf32> to vector<64x128xbf16>
    %c0_6 = arith.constant 0 : index
    %c0_7 = arith.constant 0 : index
    %9 = vector.load %arg4[%c0_6, %c0_7] : memref<128x128xbf16, #tpu.memory_space<vmem>>, vector<128x128xbf16>
    %cst_8 = arith.constant dense<0.000000e+00> : vector<64x128xf32>
    %10 = tpu.matmul %8, %9, %cst_8 {dimension_numbers = #tpu.dot_dimension_numbers<[1], [0], [0], [1], [0, 0, 1, 1], [], []>} : vector<64x128xbf16>, vector<128x128xbf16>, vector<64x128xf32> -> vector<64x128xf32>
    %c0_9 = arith.constant 0 : index
    %c0_10 = arith.constant 0 : index
    %11 = vector.load %arg5[%c0_9, %c0_10] : memref<1x128xf32, #tpu.memory_space<vmem>>, vector<1x128xf32>
    %12 = vector.broadcast %11 : vector<1x128xf32> to vector<64x128xf32>
    %13 = arith.addf %10, %12 : vector<64x128xf32>
    %cst_11 = arith.constant dense<0xFF800000> : vector<64xf32>
    %14 = vector.multi_reduction <maximumf>, %13, %cst_11 [1] : vector<64x128xf32> to vector<64xf32>
    %15 = vector.shape_cast %14 : vector<64xf32> to vector<64x1xf32>
    %16 = vector.broadcast %15 : vector<64x1xf32> to vector<64x128xf32>
    %17 = arith.subf %13, %16 : vector<64x128xf32>
    %18 = math.exp %17 : vector<64x128xf32>
    %cst_12 = arith.constant dense<0.000000e+00> : vector<64xf32>
    %19 = vector.multi_reduction <add>, %18, %cst_12 [1] : vector<64x128xf32> to vector<64xf32>
    %20 = vector.shape_cast %19 : vector<64xf32> to vector<64x1xf32>
    %21 = tpu.reciprocal %20 {approx = true} : vector<64x1xf32> -> vector<64x1xf32>
    %22 = arith.mulf %20, %21 : vector<64x1xf32>
    %cst_13 = arith.constant 2.000000e+00 : f32
    %23 = vector.broadcast %cst_13 : f32 to vector<64x1xf32>
    %24 = arith.subf %23, %22 : vector<64x1xf32>
    %25 = arith.mulf %21, %24 : vector<64x1xf32>
    %26 = vector.broadcast %25 : vector<64x1xf32> to vector<64x128xf32>
    %27 = arith.mulf %18, %26 : vector<64x128xf32>
    %c0_14 = arith.constant 0 : index
    %c0_15 = arith.constant 0 : index
    %28 = vector.load %arg8[%c0_14, %c0_15] : memref<64x128xf32, #tpu.memory_space<vmem>>, vector<64x128xf32>
    tpu.vector_store %arg8[%c0_14, %c0_15], %27 {strides = array<i32>} : memref<64x128xf32, #tpu.memory_space<vmem>>, vector<64x128xf32>,
    %29 = arith.truncf %27 : vector<64x128xf32> to vector<64x128xbf16>
    %30 = vector.shape_cast %29 : vector<64x128xbf16> to vector<4x16x128xbf16>
    %c0_16 = arith.constant 0 : index
    %c0_17 = arith.constant 0 : index
    %c0_18 = arith.constant 0 : index
    %31 = vector.load %arg6[%c0_16, %c0_17, %c0_18] : memref<4x128x32xbf16, #tpu.memory_space<vmem>>, vector<4x128x32xbf16>
    "tpu.trace_start"() <{level = 10 : i32, message = "gqk,gkd->gqd"}> : () -> ()
    %cst_19 = arith.constant dense<0.000000e+00> : vector<4x16x32xf32>
    %32 = tpu.matmul %30, %31, %cst_19 {dimension_numbers = #tpu.dot_dimension_numbers<[2], [1], [1], [2], [0, 0, 0, 1, 1, 2], [0], [0]>} : vector<4x16x128xbf16>, vector<4x128x32xbf16>, vector<4x16x32xf32> -> vector<4x16x32xf32>
    "tpu.trace_stop"() : () -> ()
    %c0_20 = arith.constant 0 : index
    %c0_21 = arith.constant 0 : index
    %c0_22 = arith.constant 0 : index
    %33 = vector.load %arg7[%c0_20, %c0_21, %c0_22] : memref<4x16x32xf32, #tpu.memory_space<vmem>>, vector<4x16x32xf32>
    tpu.vector_store %arg7[%c0_20, %c0_21, %c0_22], %32 {strides = array<i32>} : memref<4x16x32xf32, #tpu.memory_space<vmem>>, vector<4x16x32xf32>,
    return
  }
  func.func @transform_0(%arg0: i32) -> (i32, i32) {
    %c0_i32 = arith.constant 0 : i32
    %c0_i32_0 = arith.constant 0 : i32
    return %arg0, %c0_i32 : i32, i32
  }
  func.func @transform_1(%arg0: i32) -> (i32, i32) {
    %c0_i32 = arith.constant 0 : i32
    %c0_i32_0 = arith.constant 0 : i32
    %c0_i32_1 = arith.constant 0 : i32
    return %c0_i32, %c0_i32_0 : i32, i32
  }
  func.func @transform_2(%arg0: i32) -> (i32, i32) {
    %c0_i32 = arith.constant 0 : i32
    %c0_i32_0 = arith.constant 0 : i32
    %c0_i32_1 = arith.constant 0 : i32
    return %c0_i32, %c0_i32_0 : i32, i32
  }
  func.func @transform_3(%arg0: i32) -> (i32, i32) {
    %c0_i32 = arith.constant 0 : i32
    %c0_i32_0 = arith.constant 0 : i32
    %c0_i32_1 = arith.constant 0 : i32
    return %c0_i32, %c0_i32_0 : i32, i32
  }
  func.func @transform_4(%arg0: i32) -> (i32, i32) {
    %c0_i32 = arith.constant 0 : i32
    %c0_i32_0 = arith.constant 0 : i32
    %c0_i32_1 = arith.constant 0 : i32
    return %c0_i32, %c0_i32_0 : i32, i32
  }
  func.func @transform_5(%arg0: i32) -> (i32, i32, i32) {
    %c0_i32 = arith.constant 0 : i32
    %c0_i32_0 = arith.constant 0 : i32
    %c0_i32_1 = arith.constant 0 : i32
    return %arg0, %c0_i32, %c0_i32_0 : i32, i32, i32
  }
  func.func @transform_6(%arg0: i32) -> (i32, i32, i32) {
    %c0_i32 = arith.constant 0 : i32
    %c0_i32_0 = arith.constant 0 : i32
    %c0_i32_1 = arith.constant 0 : i32
    return %arg0, %c0_i32, %c0_i32_0 : i32, i32, i32
  }
  func.func @transform_7(%arg0: i32) -> (i32, i32) {
    %c0_i32 = arith.constant 0 : i32
    %c0_i32_0 = arith.constant 0 : i32
    return %arg0, %c0_i32 : i32, i32
  }
}

</mosaic_0001>

<bundles_post_ra>
// kernel: dense_attention.1
= control target key start
LH: loop header
LB: loop body
LE: loop exit
PB: predicated region body
PF: predicated region fallthrough
CT: control target
= control target key end

     0   :  { %s1259_s0 = inlined_call_operand.vmem [shape: bf16[64,32], index: 0, kind: input, shape index: {}]   ;;  %s1260_s1 = inlined_call_operand.vmem [shape: bf16[32,128], index: 1, kind: input, shape index: {}]   ;;  %s1261_s2 = inlined_call_operand.vmem [shape: f32[1,128], index: 2, kind: input, shape index: {}]   ;;  %s1262_s3 = inlined_call_operand.vmem [shape: bf16[128,128], index: 3, kind: input, shape index: {}]   ;;  %s1263_s4 = inlined_call_operand.vmem [shape: f32[1,128], index: 4, kind: input, shape index: {}]   ;;  %s1264_s5 = inlined_call_operand.vmem [shape: bf16[4,128,32], index: 5, kind: input, shape index: {}]   ;;  %s1265_s6 = inlined_call_operand.hbm [shape: f32[4,16,32], index: 6, kind: output, shape index: {0}]   ;;  %s1266_s7 = inlined_call_operand.vmem [shape: f32[64,128], index: 7, kind: output, shape index: {1}]  }
   0x1   :  { %v897_v0 = vld [vmem:[%s1260_s1 + $0x8] sm:$0xff]  ;;  %v896_v1 = vld [vmem:[%s1260_s1] sm:$0xff] }
   0x2   :  { %94 = vmatpush.bf16.msra.mxu0 %v897_v0 }
   0x3   :  { %13 = vsyncpa [#allocation3], 0  ;;  %v892_v2 = vld [vmem:[%s1259_s0] sm:$0xff]  ;;  %vm75_vm0 = vcmask 261120   ;;  %v893_v3 = vld [vmem:[%s1259_s0 + $0x8] sm:$0xff] }
   0x4   :  { %v905_v4 = vld [vmem:[%s1262_s3 + $0x38] sm:$0xff]  ;;  %v904_v5 = vld [vmem:[%s1262_s3 + $0x30] sm:$0xff]  ;;  %v903_v6 = vld [vmem:[%s1262_s3 + $0x28] sm:$0xff] }
   0x5   :  { %197 = vmatpush.bf16.msra.mxu1 %v905_v4  ;;  %v902_v7 = vld [vmem:[%s1262_s3 + $0x20] sm:$0xff]  ;;  %v894_v8 = vld [vmem:[%s1259_s0 + $0x10] sm:$0xff]  ;;  %v895_v9 = vld [vmem:[%s1259_s0 + $0x18] sm:$0xff] }
   0x6   :  { %95 = vmatpush.bf16.msra.mxu0 %v896_v1  ;;  %v901_v10 = vld [vmem:[%s1262_s3 + $0x18] sm:$0xff]  ;;  %v900_v11 = vld [vmem:[%s1262_s3 + $0x10] sm:$0xff]  ;;  %v899_v12 = vld [vmem:[%s1262_s3 + $0x8] sm:$0xff] }
   0x7   :  { %v898_v13 = vld [vmem:[%s1262_s3] sm:$0xff]  ;;  %s1002_s3 = smov 128  }
   0x8   :  { %v941_v15 = vld [vmem:[%s1261_s2] ss:$0 sm:$0xff]  ;;  %s688_s2 = sshll.u32 %s1265_s6, 4  ;;  %s689_s2 = int_to_ptr.hbm [resolvable:$true] %s688_s2 }
   0x9   :  { %728 = vmatmul.msk.bf16.vlgmr.msra.gmra.mxu0 %vm75_vm0, %v892_v2  ;;  %198 = vmatpush.bf16.msra.mxu1 %v904_v5  ;;  %v942_v43 = vld [vmem:[%s1263_s4] ss:$0 sm:$0xff]  ;;  %s1003_s4 = smov 8  }
   0xd   :  { %199 = vmatpush.bf16.msra.mxu1 %v903_v6 }
  0x11   :  { %200 = vmatpush.bf16.msra.mxu1 %v902_v7 }
  0x15   :  { %201 = vmatpush.bf16.msra.mxu1 %v901_v10 }
  0x19   :  { %729 = vmatmul.msk.bf16.gmra.mxu0 %vm75_vm0, %v893_v3  ;;  %202 = vmatpush.bf16.msra.mxu1 %v900_v11 }
  0x1d   :  { %203 = vmatpush.bf16.msra.mxu1 %v899_v12 }
  0x21   :  { %204 = vmatpush.bf16.msra.mxu1 %v898_v13 }
  0x29   :  { %730 = vmatmul.msk.bf16.gmra.mxu0 %vm75_vm0, %v894_v8 }
  0x39   :  { %731 = vmatmul.msk.bf16.gmra.mxu0 %vm75_vm0, %v895_v9 }
  0x86   :  { %v97_v14 = vpop.f32.mrf.mxu0 }
  0x87   :  { %v98_v16 = vadd.f32 %v941_v15, %v97_v14 }
  0x89   :  { %v117_v19 = vmax.f32 %v98_v16, 0.0 }
  0x8e   :  { %v99_v17 = vpop.f32.mrf.mxu0 }
  0x8f   :  { %v100_v18 = vadd.f32 %v941_v15, %v99_v17 }
  0x91   :  { %v118_v20 = vmax.f32 %v100_v18, 0.0 }
  0x93   :  { %v125_v21 = vpack.c.bf16 %v118_v20, %v117_v19 }
  0x95   :  { %205 = vmatmul.bf16.vlgmr.msra.gmra.mxu1 %v125_v21 }
  0x96   :  { %v102_v22 = vpop.f32.mrf.mxu0 }
  0x97   :  { %v103_v23 = vadd.f32 %v941_v15, %v102_v22 }
  0x99   :  { %v119_v26 = vmax.f32 %v103_v23, 0.0 }
  0x9e   :  { %v104_v24 = vpop.f32.mrf.mxu0 }
  0x9f   :  { %v105_v25 = vadd.f32 %v941_v15, %v104_v24 }
  0xa1   :  { %v120_v27 = vmax.f32 %v105_v25, 0.0 }
  0xa3   :  { %v126_v28 = vpack.c.bf16 %v120_v27, %v119_v26 }
  0xa5   :  { %210 = vmatmul.bf16.gmra.mxu1 %v126_v28 }
  0xa6   :  { %v107_v29 = vpop.f32.mrf.mxu0 }
  0xa7   :  { %v108_v30 = vadd.f32 %v941_v15, %v107_v29  ;;  %v912_v29 = vld [vmem:[%s1264_s5 + $0x30] sm:$0xff] }
  0xa9   :  { %v121_v33 = vmax.f32 %v108_v30, 0.0  ;;  %v911_v30 = vld [vmem:[%s1264_s5 + $0x28] sm:$0xff] }
  0xae   :  { %v109_v31 = vpop.f32.mrf.mxu0 }
  0xaf   :  { %v110_v32 = vadd.f32 %v941_v15, %v109_v31  ;;  %v910_v31 = vld [vmem:[%s1264_s5 + $0x20] sm:$0xff] }
  0xb1   :  { %v122_v34 = vmax.f32 %v110_v32, 0.0  ;;  %v909_v32 = vld [vmem:[%s1264_s5 + $0x18] sm:$0xff] }
  0xb3   :  { %v127_v35 = vpack.c.bf16 %v122_v34, %v121_v33  ;;  %v921_v33 = vld [vmem:[%s1264_s5 + $0x78] sm:$0xff]  ;;  %v908_v34 = vld [vmem:[%s1264_s5 + $0x10] sm:$0xff] }
  0xb4   :  { %524 = vmatpush.bf16.msra.mxu3 %v921_v33 }
  0xb5   :  { %215 = vmatmul.bf16.gmra.mxu1 %v127_v35  ;;  %v920_v35 = vld [vmem:[%s1264_s5 + $0x70] sm:$0xff] }
  0xb6   :  { %v112_v36 = vpop.f32.mrf.mxu0 }
  0xb7   :  { %v113_v37 = vadd.f32 %v941_v15, %v112_v36  ;;  %v907_v36 = vld [vmem:[%s1264_s5 + $0x8] sm:$0xff] }
  0xb8   :  { %525 = vmatpush.bf16.msra.mxu3 %v920_v35  ;;  %v930_v35 = vld [vmem:[%s1264_s5 + $0xc0] sm:$0xff] }
  0xb9   :  { %v123_v40 = vmax.f32 %v113_v37, 0.0  ;;  %v919_v37 = vld [vmem:[%s1264_s5 + $0x68] sm:$0xff] }
  0xbc   :  { %526 = vmatpush.bf16.msra.mxu3 %v919_v37 }
  0xbe   :  { %v114_v38 = vpop.f32.mrf.mxu0 }
  0xbf   :  { %v115_v39 = vadd.f32 %v941_v15, %v114_v38  ;;  %v913_v15 = vld [vmem:[%s1264_s5 + $0x38] sm:$0xff]  ;;  %v906_v38 = vld [vmem:[%s1264_s5] sm:$0xff] }
  0xc0   :  { %456 = vmatpush.bf16.msra.mxu2 %v913_v15 }
  0xc1   :  { %v124_v41 = vmax.f32 %v115_v39, 0.0  ;;  %v918_v39 = vld [vmem:[%s1264_s5 + $0x60] sm:$0xff] }
  0xc2   :  { %527 = vmatpush.bf16.msra.mxu3 %v918_v39 }
  0xc3   :  { %v128_v42 = vpack.c.bf16 %v124_v41, %v123_v40  ;;  %v917_v40 = vld [vmem:[%s1264_s5 + $0x58] sm:$0xff] }
  0xc4   :  { %457 = vmatpush.bf16.msra.mxu2 %v912_v29  ;;  %v929_v41 = vld [vmem:[%s1264_s5 + $0xb8] sm:$0xff] }
  0xc5   :  { %220 = vmatmul.bf16.gmra.mxu1 %v128_v42 }
  0xc6   :  { %528 = vmatpush.bf16.msra.mxu3 %v917_v40 }
  0xc8   :  { %458 = vmatpush.bf16.msra.mxu2 %v911_v30 }
  0xcc   :  { %459 = vmatpush.bf16.msra.mxu2 %v910_v31 }
  0xd0   :  { %460 = vmatpush.bf16.msra.mxu2 %v909_v32 }
  0xd4   :  { %461 = vmatpush.bf16.msra.mxu2 %v908_v34 }
  0xd8   :  { %462 = vmatpush.bf16.msra.mxu2 %v907_v36 }
  0xdc   :  { %463 = vmatpush.bf16.msra.mxu2 %v906_v38 }
  0xe0   :  { %592 = vmatpush.bf16.msrb.mxu2 %v929_v41 }
 0x112   :  { %v206_v44 = vpop.f32.mrf.mxu1 }
 0x113   :  { %v207_v45 = vadd.f32 %v942_v43, %v206_v44  ;;  %v928_v44 = vld [vmem:[%s1264_s5 + $0xb0] sm:$0xff] }
 0x114   :  { %593 = vmatpush.bf16.msrb.mxu2 %v928_v44 }
 0x115   :  { %226 = vmax.xlane.f32.xlu0 %v207_v45 }
 0x11a   :  { %v208_v46 = vpop.f32.mrf.mxu1 }
 0x11b   :  { %v209_v47 = vadd.f32 %v942_v43, %v208_v46  ;;  %v927_v46 = vld [vmem:[%s1264_s5 + $0xa8] sm:$0xff] }
 0x11c   :  { %594 = vmatpush.bf16.msrb.mxu2 %v927_v46 }
 0x11d   :  { %228 = vmax.xlane.f32.xlu0 %v209_v47 }
 0x122   :  { %v211_v48 = vpop.f32.mrf.mxu1 }
 0x123   :  { %v212_v49 = vadd.f32 %v942_v43, %v211_v48 }
 0x125   :  { %230 = vmax.xlane.f32.xlu1 %v212_v49 }
 0x12a   :  { %v213_v50 = vpop.f32.mrf.mxu1 }
 0x12b   :  { %v214_v51 = vadd.f32 %v942_v43, %v213_v50  ;;  %v914_v50 = vld [vmem:[%s1264_s5 + $0x40] sm:$0xff] }
 0x12d   :  { %232 = vmax.xlane.f32.xlu1 %v214_v51 }
 0x132   :  { %v216_v52 = vpop.f32.mrf.mxu1 }
 0x133   :  { %v217_v53 = vadd.f32 %v942_v43, %v216_v52 }
 0x135   :  { %234 = vmax.xlane.f32.xlu2 %v217_v53 }
 0x13a   :  { %v218_v54 = vpop.f32.mrf.mxu1 }
 0x13b   :  { %v219_v55 = vadd.f32 %v942_v43, %v218_v54  ;;  %v925_v54 = vld [vmem:[%s1264_s5 + $0x98] sm:$0xff] }
 0x13d   :  { %236 = vmax.xlane.f32.xlu2 %v219_v55 }
 0x142   :  { %v221_v56 = vpop.f32.mrf.mxu1 }
 0x143   :  { %v222_v57 = vadd.f32 %v942_v43, %v221_v56 }
 0x145   :  { %238 = vmax.xlane.f32.xlu0 %v222_v57 }
 0x14a   :  { %v223_v58 = vpop.f32.mrf.mxu1 }
 0x14b   :  { %v224_v59 = vadd.f32 %v942_v43, %v223_v58  ;;  %v916_v43 = vld [vmem:[%s1264_s5 + $0x50] sm:$0xff] }
 0x14c   :  { %529 = vmatpush.bf16.msra.mxu3 %v916_v43 }
 0x14d   :  { %240 = vmax.xlane.f32.xlu1 %v224_v59 }
 0x188   :  { %v227_v60 = vpop.xlane.xlu0 %226 }
 0x189   :  { %v242_v61 = vsub.f32 %v207_v45, %v227_v60  ;;  %v915_v45 = vld [vmem:[%s1264_s5 + $0x48] sm:$0xff]  ;;  %v924_v60 = vld [vmem:[%s1264_s5 + $0x90] sm:$0xff] }
 0x18a   :  { %530 = vmatpush.bf16.msra.mxu3 %v915_v45 }
 0x18b   :  { %v250_v62 = vmul.f32 1.442695, %v242_v61  ;;  %v936_v61 = vld [vmem:[%s1264_s5 + $0xf0] sm:$0xff] }
 0x18d   :  { %943 = vpow2.f32 %v250_v62 }
 0x18e   :  { %531 = vmatpush.bf16.msra.mxu3 %v914_v50 }
 0x190   :  { %v229_v63 = vpop.xlane.xlu0 %228 }
 0x191   :  { %v243_v0 = vsub.f32 %v209_v47, %v229_v63 }
 0x193   :  { %v1096_v1 = vpop.eup %943  ;;  %v252_v2 = vmul.f32 1.442695, %v243_v0  ;;  %v923_v0 = vld [vmem:[%s1264_s5 + $0x88] sm:$0xff] }
 0x194   :  { %266 = vadd.xlane.f32.xlu2 %v1096_v1 }
 0x195   :  { %945 = vpow2.f32 %v252_v2 }
 0x198   :  { %v231_v3 = vpop.xlane.xlu1 %230 }
 0x199   :  { %v244_v4 = vsub.f32 %v212_v49, %v231_v3 }
 0x19b   :  { %v1099_v5 = vpop.eup %945  ;;  %v254_v6 = vmul.f32 1.442695, %v244_v4 }
 0x19c   :  { %268 = vadd.xlane.f32.xlu0 %v1099_v5 }
 0x19d   :  { %947 = vpow2.f32 %v254_v6 }
 0x1a0   :  { %v233_v7 = vpop.xlane.xlu1 %232 }
 0x1a1   :  { %v245_v8 = vsub.f32 %v214_v51, %v233_v7  ;;  %v926_v51 = vld [vmem:[%s1264_s5 + $0xa0] sm:$0xff] }
 0x1a2   :  { %595 = vmatpush.bf16.msrb.mxu2 %v926_v51 }
 0x1a3   :  { %v1102_v9 = vpop.eup %947  ;;  %v256_v10 = vmul.f32 1.442695, %v245_v8 }
 0x1a4   :  { %270 = vadd.xlane.f32.xlu1 %v1102_v9 }
 0x1a5   :  { %949 = vpow2.f32 %v256_v10  ;;  %v922_v10 = vld [vmem:[%s1264_s5 + $0x80] sm:$0xff] }
 0x1a6   :  { %596 = vmatpush.bf16.msrb.mxu2 %v925_v54 }
 0x1a8   :  { %v235_v11 = vpop.xlane.xlu2 %234 }
 0x1a9   :  { %v246_v12 = vsub.f32 %v217_v53, %v235_v11 }
 0x1aa   :  { %597 = vmatpush.bf16.msrb.mxu2 %v924_v60 }
 0x1ab   :  { %v1105_v13 = vpop.eup %949  ;;  %v258_v14 = vmul.f32 1.442695, %v246_v12 }
 0x1ac   :  { %272 = vadd.xlane.f32.xlu2 %v1105_v13 }
 0x1ad   :  { %951 = vpow2.f32 %v258_v14 }
 0x1ae   :  { %598 = vmatpush.bf16.msrb.mxu2 %v923_v0 }
 0x1b0   :  { %v237_v16 = vpop.xlane.xlu2 %236 }
 0x1b1   :  { %v247_v17 = vsub.f32 %v219_v55, %v237_v16  ;;  %v937_v55 = vld [vmem:[%s1264_s5 + $0xf8] sm:$0xff] }
 0x1b2   :  { %660 = vmatpush.bf16.msrb.mxu3 %v937_v55  ;;  %599 = vmatpush.bf16.msrb.mxu2 %v922_v10 }
 0x1b3   :  { %v1111_v18 = vpop.eup %951  ;;  %v260_v19 = vmul.f32 1.442695, %v247_v17  ;;  %v933_v17 = vld [vmem:[%s1264_s5 + $0xd8] sm:$0xff] }
 0x1b4   :  { %274 = vadd.xlane.f32.xlu0 %v1111_v18 }
 0x1b5   :  { %953 = vpow2.f32 %v260_v19 }
 0x1b6   :  { %661 = vmatpush.bf16.msrb.mxu3 %v936_v61 }
 0x1b8   :  { %v239_v20 = vpop.xlane.xlu0 %238 }
 0x1b9   :  { %v248_v21 = vsub.f32 %v222_v57, %v239_v20 }
 0x1bb   :  { %v1114_v22 = vpop.eup %953  ;;  %v262_v23 = vmul.f32 1.442695, %v248_v21 }
 0x1bc   :  { %276 = vadd.xlane.f32.xlu1 %v1114_v22 }
 0x1bd   :  { %955 = vpow2.f32 %v262_v23 }
 0x1c0   :  { %v241_v24 = vpop.xlane.xlu1 %240 }
 0x1c1   :  { %v249_v25 = vsub.f32 %v224_v59, %v241_v24  ;;  %v932_v24 = vld [vmem:[%s1264_s5 + $0xd0] sm:$0xff] }
 0x1c3   :  { %v1117_v26 = vpop.eup %955  ;;  %v264_v27 = vmul.f32 1.442695, %v249_v25 }
 0x1c4   :  { %278 = vadd.xlane.f32.xlu2 %v1117_v26 }
 0x1c5   :  { %957 = vpow2.f32 %v264_v27 }
 0x1cb   :  { %v1120_v28 = vpop.eup %957 }
 0x1cc   :  { %280 = vadd.xlane.f32.xlu0 %v1120_v28 }
 0x207   :  { %v267_v42 = vpop.xlane.xlu2 %266 }
 0x208   :  { %959 = vrcp.f32 %v267_v42 }
 0x20e   :  { %v960_v47 = vpop.eup %959 }
 0x20f   :  { %v290_v48 = vmul.f32 %v960_v47, %v267_v42  ;;  %v269_v49 = vpop.xlane.xlu0 %268 }
 0x210   :  { %961 = vrcp.f32 %v269_v49 }
 0x211   :  { %v298_v52 = vsub.f32 2.0, %v290_v48 }
 0x213   :  { %v306_v53 = vmul.f32 %v960_v47, %v298_v52 }
 0x215   :  { %v314_v56 = vmul.f32 %v1096_v1, %v306_v53  ;;  %v935_v1 = vld [vmem:[%s1264_s5 + $0xe8] sm:$0xff] }
 0x216   :  { %v962_v57 = vpop.eup %961  ;;  %662 = vmatpush.bf16.msrb.mxu3 %v935_v1 }
 0x217   :  { %v291_v58 = vmul.f32 %v962_v57, %v269_v49  ;;  %v271_v59 = vpop.xlane.xlu1 %270  ;;  %322 = vst [vmem:[%s1266_s7] sm:$0xff] %v314_v56  ;;  %v330_v3 = vpack.c.bf16 %v314_v56, %v314_v56 }
 0x218   :  { %963 = vrcp.f32 %v271_v59 }
 0x219   :  { %v299_v62 = vsub.f32 2.0, %v291_v58  ;;  %v404_v12 = vunpack.c.l.b16 %v330_v3 }
 0x21b   :  { %v307_v63 = vmul.f32 %v962_v57, %v299_v62 }
 0x21d   :  { %v315_v2 = vmul.f32 %v1099_v5, %v307_v63  ;;  %v934_v5 = vld [vmem:[%s1264_s5 + $0xe0] sm:$0xff] }
 0x21e   :  { %v964_v4 = vpop.eup %963  ;;  %663 = vmatpush.bf16.msrb.mxu3 %v934_v5 }
 0x21f   :  { %v292_v6 = vmul.f32 %v964_v4, %v271_v59  ;;  %v273_v7 = vpop.xlane.xlu2 %272  ;;  %323 = vst [vmem:[%s1266_s7 + $0x8] sm:$0xff] %v315_v2  ;;  %v331_v8 = vpack.c.bf16 %v315_v2, %v315_v2 }
 0x220   :  { %965 = vrcp.f32 %v273_v7 }
 0x221   :  { %v300_v11 = vsub.f32 2.0, %v292_v6  ;;  %v405_v14 = vunpack.c.l.b16 %v331_v8 }
 0x222   :  { %664 = vmatpush.bf16.msrb.mxu3 %v933_v17 }
 0x223   :  { %v308_v15 = vmul.f32 %v964_v4, %v300_v11  ;;  %v406_v16 = vpack.c.b16 %v405_v14, %v404_v12 }
 0x225   :  { %464 = vmatmul.bf16.vlgmr.msra.gmra.mxu2 %v406_v16  ;;  %v316_v19 = vmul.f32 %v1102_v9, %v308_v15  ;;  %v931_v9 = vld [vmem:[%s1264_s5 + $0xc8] sm:$0xff] }
 0x226   :  { %v966_v20 = vpop.eup %965  ;;  %665 = vmatpush.bf16.msrb.mxu3 %v932_v24 }
 0x227   :  { %v293_v21 = vmul.f32 %v966_v20, %v273_v7  ;;  %v275_v23 = vpop.xlane.xlu0 %274  ;;  %324 = vst [vmem:[%s1266_s7 + $0x10] sm:$0xff] %v316_v19  ;;  %v332_v30 = vpack.c.bf16 %v316_v19, %v316_v19 }
 0x228   :  { %967 = vrcp.f32 %v275_v23 }
 0x229   :  { %v301_v25 = vsub.f32 2.0, %v293_v21  ;;  %v472_v37 = vunpack.c.l.b16 %v332_v30 }
 0x22a   :  { %666 = vmatpush.bf16.msrb.mxu3 %v931_v9 }
 0x22b   :  { %v309_v27 = vmul.f32 %v966_v20, %v301_v25 }
 0x22d   :  { %v317_v29 = vmul.f32 %v1105_v13, %v309_v27 }
 0x22e   :  { %v968_v31 = vpop.eup %967  ;;  %667 = vmatpush.bf16.msrb.mxu3 %v930_v35 }
 0x22f   :  { %v294_v32 = vmul.f32 %v968_v31, %v275_v23  ;;  %v277_v33 = vpop.xlane.xlu1 %276  ;;  %325 = vst [vmem:[%s1266_s7 + $0x18] sm:$0xff] %v317_v29  ;;  %v333_v34 = vpack.c.bf16 %v317_v29, %v317_v29 }
 0x230   :  { %969 = vrcp.f32 %v277_v33 }
 0x231   :  { %v302_v36 = vsub.f32 2.0, %v294_v32  ;;  %v473_v38 = vunpack.c.l.b16 %v333_v34 }
 0x233   :  { %v310_v13 = vmul.f32 %v968_v31, %v302_v36  ;;  %v474_v39 = vpack.c.b16 %v473_v38, %v472_v37 }
 0x235   :  { %v318_v40 = vmul.f32 %v1111_v18, %v310_v13  ;;  %532 = vmatmul.bf16.vlgmr.msra.gmra.mxu3 %v474_v39 }
 0x236   :  { %v970_v41 = vpop.eup %969 }
 0x237   :  { %326 = vst [vmem:[%s1266_s7 + $0x20] sm:$0xff] %v318_v40  ;;  %v295_v42 = vmul.f32 %v970_v41, %v277_v33  ;;  %v279_v43 = vpop.xlane.xlu2 %278  ;;  %v334_v47 = vpack.c.bf16 %v318_v40, %v318_v40 }
 0x238   :  { %971 = vrcp.f32 %v279_v43 }
 0x239   :  { %v303_v44 = vsub.f32 2.0, %v295_v42  ;;  %v540_v52 = vunpack.c.l.b16 %v334_v47 }
 0x23b   :  { %v311_v45 = vmul.f32 %v970_v41, %v303_v44 }
 0x23d   :  { %v319_v46 = vmul.f32 %v1114_v22, %v311_v45 }
 0x23e   :  { %v972_v48 = vpop.eup %971 }
 0x23f   :  { %327 = vst [vmem:[%s1266_s7 + $0x28] sm:$0xff] %v319_v46  ;;  %v296_v18 = vmul.f32 %v972_v48, %v279_v43  ;;  %v281_v49 = vpop.xlane.xlu0 %280  ;;  %v335_v50 = vpack.c.bf16 %v319_v46, %v319_v46 }
 0x240   :  { %973 = vrcp.f32 %v281_v49 }
 0x241   :  { %v304_v51 = vsub.f32 2.0, %v296_v18  ;;  %v541_v53 = vunpack.c.l.b16 %v335_v50 }
 0x243   :  { %v312_v54 = vmul.f32 %v972_v48, %v304_v51  ;;  %v542_v55 = vpack.c.b16 %v541_v53, %v540_v52 }
 0x245   :  { %v320_v56 = vmul.f32 %v1117_v26, %v312_v54  ;;  %600 = vmatmul.bf16.vlgmr.msrb.gmra.mxu2 %v542_v55 }
 0x246   :  { %v974_v57 = vpop.eup %973 }
 0x247   :  { %328 = vst [vmem:[%s1266_s7 + $0x30] sm:$0xff] %v320_v56  ;;  %v297_v22 = vmul.f32 %v974_v57, %v281_v49  ;;  %v336_v61 = vpack.c.bf16 %v320_v56, %v320_v56 }
 0x249   :  { %v305_v58 = vsub.f32 2.0, %v297_v22  ;;  %v608_v63 = vunpack.c.l.b16 %v336_v61 }
 0x24b   :  { %v313_v59 = vmul.f32 %v974_v57, %v305_v58 }
 0x24d   :  { %v321_v60 = vmul.f32 %v1120_v28, %v313_v59 }
 0x24f   :  { %329 = vst [vmem:[%s1266_s7 + $0x38] sm:$0xff] %v321_v60  ;;  %v337_v62 = vpack.c.bf16 %v321_v60, %v321_v60  ;;  %s1001_s7 = smov [#allocation2]  }
 0x250   :  { %s686_s27 = sshll.u32 %s1001_s7, 4  ;;  %s687_s27 = int_to_ptr.vmem [resolvable:$true] %s686_s27 }
 0x251   :  { %v609_v0 = vunpack.c.l.b16 %v337_v62 }
 0x253   :  { %v610_v26 = vpack.c.b16 %v609_v0, %v608_v63 }
 0x255   :  { %668 = vmatmul.bf16.vlgmr.msrb.gmra.mxu3 %v610_v26 }
 0x2a8   :  { %v465_v1 = vpop.f32.mrf.mxu2 }
 0x2a9   :  { %674 = vst.msk [vmem:[#allocation2] sm:$0xff] %vm75_vm0, %v465_v1 }
 0x2b0   :  { %v467_v2 = vpop.f32.mrf.mxu2 }
 0x2b1   :  { %675 = vst.msk [vmem:[#allocation2 + $0x8] sm:$0xff] %vm75_vm0, %v467_v2 }
 0x2b8   :  { %v533_v3 = vpop.f32.mrf.mxu3 }
 0x2b9   :  { %676 = vst.msk [vmem:[#allocation2 + $0x10] sm:$0xff] %vm75_vm0, %v533_v3 }
 0x2c0   :  { %v535_v28 = vpop.f32.mrf.mxu3 }
 0x2c1   :  { %677 = vst.msk [vmem:[#allocation2 + $0x18] sm:$0xff] %vm75_vm0, %v535_v28 }
 0x2c8   :  { %v601_v4 = vpop.f32.mrf.mxu2 }
 0x2c9   :  { %678 = vst.msk [vmem:[#allocation2 + $0x20] sm:$0xff] %vm75_vm0, %v601_v4 }
 0x2d0   :  { %v603_v6 = vpop.f32.mrf.mxu2 }
 0x2d1   :  { %679 = vst.msk [vmem:[#allocation2 + $0x28] sm:$0xff] %vm75_vm0, %v603_v6 }
 0x2d8   :  { %v669_v7 = vpop.f32.mrf.mxu3 }
 0x2d9   :  { %680 = vst.msk [vmem:[#allocation2 + $0x30] sm:$0xff] %vm75_vm0, %v669_v7 }
 0x2e0   :  { %v671_v8 = vpop.f32.mrf.mxu3 }
 0x2e1   :  { %681 = vst.msk [vmem:[#allocation2 + $0x38] sm:$0xff] %vm75_vm0, %v671_v8 }
 0x2e2   :  { %694 = dma.vmem_to_hbm [thread:$0]  %s687_s27, 1024, %s689_s2, [#allocation3], %s1002_s3, %s1002_s3, %s1003_s4  }
 0x2e3   :  { %999 = dma.done.wait [#allocation3], 1024  }
 0x2e4   :  { %1000 = vsyncadd [#allocation3], 4294966272 }
 0x2e5   :  { %703 = vsyncpa [#allocation3], 1 }

</bundles_post_ra>
